<compile_context>
chip_gen: v7x
topology: tpu7x:2x2x1
jax: 0.10.0
libtpu: 0.0.40
codegen_flags: <defaults>
</compile_context>

<pallas_src>
import math

import jax
import jax.numpy as jnp
from jax.experimental import pallas as pl
from jax.experimental.pallas import tpu as pltpu


# Per-buffer tile target. Input + output are each double-buffered by the
# Pallas pipeline, so peak VMEM ~= 4 * tile + overhead, comfortably inside the
# 32 MiB scoped budget requested below on every generation
# (v5e/v6e: 128 MiB physical, v7x: 64 MiB physical).
_TARGET_TILE_BYTES = 4 * 1024 * 1024
_VMEM_LIMIT_BYTES = 32 * 1024 * 1024
# Candidate lane widths for the flattened view, widest first; all are
# multiples of 128 so stores are full-width (no masked vst.msk).
_LANE_CANDIDATES = (8192, 4096, 2048, 1024, 512, 256, 128)


def _copy_kernel(x_ref, o_ref):
    # Pure VMEM tile copy — the reshape is a zero-cost row-major view, so the
    # only work is moving bytes; the binding resource is HBM bandwidth.
    o_ref[...] = x_ref[...]


def _sublane_pack(itemsize):
    # Rows per packed sublane group: f32 -> 8, bf16/f16 -> 16, int8/fp8 -> 32.
    return max(8, 32 // max(1, itemsize))


def _largest_divisor_multiple(n, pack, upper):
    """Largest divisor of `n` that is a multiple of `pack` and <= `upper`."""
    best = None
    d = 1
    while d * d <= n:
        if n % d == 0:
            for cand in (d, n // d):
                if cand % pack == 0 and cand <= upper:
                    if best is None or cand > best:
                        best = cand
        d += 1
    return best


def _plan_flat_copy(total, itemsize):
    """Pick (view_shape, block_shape, grid) for copying `total` elements."""
    nbytes = total * itemsize
    pack = _sublane_pack(itemsize)

    # Lane-dense column width: widest candidate multiple of 128 dividing total.
    cols = None
    for cand in _LANE_CANDIDATES:
        if total % cand == 0:
            cols = cand
            break
    if cols is None:
        # Not factorable into full 128-lane rows: a single full-extent block
        # is always a legal BlockSpec (only hit for small/odd shapes).
        return (1, total), (1, total), (1,)

    rows = total // cols

    # Small arrays: one full-extent block, one grid step, one DMA pair.
    if nbytes <= _TARGET_TILE_BYTES or rows < pack:
        return (rows, cols), (rows, cols), (1,)

    # Large arrays: tile rows in multiples of the dtype sublane pack, sized so
    # the double-buffered pipeline stays inside the VMEM budget.
    max_tile_rows = max(pack, _TARGET_TILE_BYTES // (cols * itemsize))
    tile_rows = _largest_divisor_multiple(rows, pack, max_tile_rows)
    if tile_rows is None:
        tile_rows = rows  # full extent along rows is always legal
    return (rows, cols), (tile_rows, cols), (rows // tile_rows,)


def _pallas_reshape_copy(x, out_shape):
    """Row-major-preserving reshape routed through a lane-dense Pallas copy."""
    total = x.size
    itemsize = jnp.dtype(x.dtype).itemsize
    view_shape, block_shape, grid = _plan_flat_copy(total, itemsize)

    flat = x.reshape(view_shape)
    y = pl.pallas_call(
        _copy_kernel,
        out_shape=jax.ShapeDtypeStruct(view_shape, x.dtype),
        grid=grid,
        in_specs=[pl.BlockSpec(block_shape, lambda i: (i, 0))],
        out_specs=pl.BlockSpec(block_shape, lambda i: (i, 0)),
        # Reuse the input HBM buffer for the output — no second allocation.
        input_output_aliases={0: 0},
        cost_estimate=pl.CostEstimate(
            flops=0, transcendentals=0, bytes_accessed=2 * total * itemsize
        ),
        compiler_params=pltpu.CompilerParams(
            dimension_semantics=("parallel",),
            vmem_limit_bytes=_VMEM_LIMIT_BYTES,
        ),
    )(flat)
    return y.reshape(out_shape)


def explode_group_dim(x):
    """Pallas equivalent of torch `x.view(s[0], -1, s[-2], s[-1])`:
    collapse all dims between batch and the trailing spatial dims."""
    s = x.shape
    assert len(s) >= 3, "need at least (B, ..., H, W)"
    B, H, W = s[0], s[-2], s[-1]
    mid = math.prod(s[1:-2]) if len(s) > 3 else 1
    return _pallas_reshape_copy(x, (B, mid, H, W))


if __name__ == "__main__":
    key = jax.random.PRNGKey(0)
    # [B, G, C, H, W] = [2, 4, 3, 16, 16] -> expect [2, 12, 16, 16]
    x = jax.random.normal(key, (2, 4, 3, 16, 16), dtype=jnp.float32)

    # Reference semantics: torch.view == row-major reshape.
    ref = x.reshape(x.shape[0], -1, x.shape[-2], x.shape[-1])

    y = explode_group_dim(x)
    y = jax.block_until_ready(y)

    assert y.shape == (2, 12, 16, 16), y.shape
    assert y.dtype == x.dtype
    assert jnp.array_equal(y, ref)

    print("KERNEL_OK")
</pallas_src>

<mosaic_0001>
module attributes {stable_mosaic.version = 11 : i64} {
  func.func @_copy_kernel(%arg0: i32, %arg1: memref<3x2048xf32, #tpu.memory_space<vmem>>, %arg2: memref<3x2048xf32, #tpu.memory_space<vmem>>) attributes {dimension_semantics = [#tpu.dimension_semantics<parallel>], iteration_bounds = array<i64: 1>, scalar_prefetch = 0 : i64, scratch_operands = 0 : i64, tpu.core_type = #tpu.core_type<tc>, window_params = [{transform_indices = @transform_0, window_bounds = array<i64: 3, 2048>}, {transform_indices = @transform_1, window_bounds = array<i64: 3, 2048>}]} {
    %c0 = arith.constant 0 : index
    %c0_0 = arith.constant 0 : index
    %0 = vector.load %arg1[%c0, %c0_0] : memref<3x2048xf32, #tpu.memory_space<vmem>>, vector<3x2048xf32>
    %c0_1 = arith.constant 0 : index
    %c0_2 = arith.constant 0 : index
    %1 = vector.load %arg2[%c0_1, %c0_2] : memref<3x2048xf32, #tpu.memory_space<vmem>>, vector<3x2048xf32>
    tpu.vector_store %arg2[%c0_1, %c0_2], %0 {strides = array<i32>} : memref<3x2048xf32, #tpu.memory_space<vmem>>, vector<3x2048xf32>,
    return
  }
  func.func @transform_0(%arg0: i32) -> (i32, i32) {
    %c0_i32 = arith.constant 0 : i32
    %c0_i32_0 = arith.constant 0 : i32
    return %arg0, %c0_i32 : i32, i32
  }
  func.func @transform_1(%arg0: i32) -> (i32, i32) {
    %c0_i32 = arith.constant 0 : i32
    %c0_i32_0 = arith.constant 0 : i32
    return %arg0, %c0_i32 : i32, i32
  }
}

</mosaic_0001>

<bundles_post_ra>
// kernel: tpu_custom_call.1
= control target key start
LH: loop header
LB: loop body
LE: loop exit
PB: predicated region body
PF: predicated region fallthrough
CT: control target
= control target key end

     0   :  { %6 = vsyncpa [#allocation3], 0  ;;  %s138_s0 = inlined_call_operand.hbm [shape: f32[3,2048], index: 0, kind: input, shape index: {}, may-alias: {0,1}]   ;;  %s139_s1 = inlined_call_operand.hbm [shape: f32[3,2048], index: 1, kind: output, shape index: {}, may-alias: {0,1}]  }
   0x1   :  { %7 = vsyncpa [#allocation4], 0  ;;  %s102_s6 = smov [#allocation2]   ;;  %s54_s10 = scalar_lea.hbm %s138_s0, 1024 }
   0x2   :  { %s14_s7 = sshll.u32 %s102_s6, 4  ;;  %p55_p0 = scmp.ne.s32.totalorder %s138_s0, %s54_s10  ;;  %s15_s7 = int_to_ptr.vmem [resolvable:$true] %s14_s7 }
   0x3   :  { %p58_p1 = scmp.lt.u32.totalorder %s54_s10, %s138_s0 }
   0x5   :  { %p60_p2 = pnand %p58_p1, %p55_p0 }
   0x7   :  { %63 = shalt.err (!%p60_p2)
}
   0x8   :  { %s64_s15 = scalar_lea.vmem %s15_s7, 1024  ;;  %p69_p4 = scmp.lt.s32.totalorder %s15_s7, %s15_s7 }
   0x9   :  { %p65_p3 = scmp.ne.s32.totalorder %s15_s7, %s64_s15  ;;  %p70_p5 = scmp.lt.s32.totalorder %s64_s15, %s64_s15 }
   0xb   :  { %p71_p6 = por %p70_p5, %p69_p4 }
   0xd   :  { %p72_p7 = pnand %p71_p6, %p65_p3 }
   0xf   :  { %75 = shalt.err (!%p72_p7)
}
  0x10   :  { %17 = dma.hbm_to_vmem [thread:$0]  %s138_s0, 1024, %s15_s7, [#allocation3]  }
  0x11   :  { %98 = dma.done.wait [#allocation3], 1024  }
  0x12   :  { %99 = vsyncadd [#allocation3], 4294966272  ;;  %s103_s18 = smov [#allocation5]   ;;  %v21_v0 = vld [vmem:[#allocation2] sm:$0x77] }
  0x13   :  { %s43_s19 = sshll.u32 %s103_s18, 4  ;;  %v22_v1 = vld [vmem:[#allocation2 + $0x8] sm:$0x77]  ;;  %v23_v2 = vld [vmem:[#allocation2 + $0x10] sm:$0x77]  ;;  %s44_s19 = int_to_ptr.vmem [resolvable:$true] %s43_s19 }
  0x14   :  { %29 = vst [vmem:[#allocation5] sm:$0x77] %v21_v0  ;;  %30 = vst [vmem:[#allocation5 + $0x8] sm:$0x77] %v22_v1  ;;  %v24_v3 = vld [vmem:[#allocation2 + $0x18] sm:$0x77]  ;;  %p81_p9 = scmp.lt.s32.totalorder %s44_s19, %s44_s19 }
  0x15   :  { %31 = vst [vmem:[#allocation5 + $0x10] sm:$0x77] %v23_v2  ;;  %v25_v4 = vld [vmem:[#allocation2 + $0x20] sm:$0x77]  ;;  %v26_v5 = vld [vmem:[#allocation2 + $0x28] sm:$0x77] }
  0x16   :  { %32 = vst [vmem:[#allocation5 + $0x18] sm:$0x77] %v24_v3  ;;  %33 = vst [vmem:[#allocation5 + $0x20] sm:$0x77] %v25_v4  ;;  %v27_v6 = vld [vmem:[#allocation2 + $0x30] sm:$0x77] }
  0x17   :  { %34 = vst [vmem:[#allocation5 + $0x28] sm:$0x77] %v26_v5  ;;  %v28_v7 = vld [vmem:[#allocation2 + $0x38] sm:$0x77]  ;;  %35 = vst [vmem:[#allocation5 + $0x30] sm:$0x77] %v27_v6 }
  0x18   :  { %36 = vst [vmem:[#allocation5 + $0x38] sm:$0x77] %v28_v7  ;;  %s76_s0 = scalar_lea.vmem %s44_s19, 1024 }
  0x19   :  { %p77_p8 = scmp.ne.s32.totalorder %s44_s19, %s76_s0  ;;  %p82_p10 = scmp.lt.s32.totalorder %s76_s0, %s76_s0 }
  0x1b   :  { %p83_p11 = por %p82_p10, %p81_p9 }
  0x1d   :  { %p84_p12 = pnand %p83_p11, %p77_p8 }
  0x1f   :  { %87 = shalt.err (!%p84_p12)
}
  0x20   :  { %s88_s22 = scalar_lea.hbm %s139_s1, 1024 }
  0x21   :  { %p89_p13 = scmp.ne.s32.totalorder %s139_s1, %s88_s22  ;;  %p92_p0 = scmp.lt.u32.totalorder %s88_s22, %s139_s1 }
  0x23   :  { %p94_p1 = pnand %p92_p0, %p89_p13 }
  0x25   :  { %97 = shalt.err (!%p94_p1)
}
  0x26   :  { %46 = dma.vmem_to_hbm [thread:$0]  %s44_s19, 1024, %s139_s1, [#allocation4]  }
  0x27   :  { %100 = dma.done.wait [#allocation4], 1024  }
  0x28   :  { %101 = vsyncadd [#allocation4], 4294966272 }
  0x29   :  { %50 = vsyncpa [#allocation3], 1 }
  0x2a   :  { %51 = vsyncpa [#allocation4], 1 }

</bundles_post_ra>
